<compile_context>
chip_gen: v5e
topology: v5e:2x2
jax: 0.10.0
libtpu: 0.0.40
codegen_flags: <defaults>
</compile_context>

<pallas_src>
import jax
import jax.numpy as jnp
from jax.experimental import pallas as pl
from jax.experimental.pallas import tpu as pltpu

INPUT_SIZE = 784
HIDDEN = 50
NUM_CLASSES = 10
LANE_PAD = 128  # lane-aligned width used for the hidden and output feature dims


def _round_up(n, m):
    return ((n + m - 1) // m) * m


def mlp_kernel(x_ref, w1_ref, b1_ref, w2_ref, b2_ref, o_ref):
    # fc1: cast the f32 x tile to bf16 in-register, bf16 MXU matmul with f32
    # accumulation; bias + ReLU stay in f32 on the VPU.
    x = x_ref[...].astype(jnp.bfloat16)
    h = jnp.dot(x, w1_ref[...], preferred_element_type=jnp.float32)
    h = jnp.maximum(h + b1_ref[...], 0.0)
    # fc2: cast activations back to bf16 for the MXU, accumulate in f32.
    out = jnp.dot(h.astype(w2_ref.dtype), w2_ref[...],
                  preferred_element_type=jnp.float32)
    o_ref[...] = (out + b2_ref[...]).astype(o_ref.dtype)


def prepare_params(w1, b1, w2, b2):
    """Zero-pad feature dims to 128 lanes and cast the weight matrices to bf16.

    Padded hidden columns give relu(0 + 0) = 0 and hit zero rows of W2, and
    padded output columns get bias 0, so the math in [:, :10] is unchanged.
    """
    # TODO(synk): on v7x only, W1/x could be quantized to fp8 (e4m3) for fc1 to
    # cut the dominant HBM stream further; kept bf16 here for portability.
    w1p = jnp.zeros((INPUT_SIZE, LANE_PAD), jnp.bfloat16)
    w1p = w1p.at[:, :HIDDEN].set(w1.astype(jnp.bfloat16))
    b1p = jnp.zeros((1, LANE_PAD), jnp.float32).at[0, :HIDDEN].set(b1.reshape(-1))
    w2p = jnp.zeros((LANE_PAD, LANE_PAD), jnp.bfloat16)
    w2p = w2p.at[:HIDDEN, :NUM_CLASSES].set(w2.astype(jnp.bfloat16))
    b2p = jnp.zeros((1, LANE_PAD), jnp.float32).at[0, :NUM_CLASSES].set(b2.reshape(-1))
    return w1p, b1p, w2p, b2p


def mlp_forward(x, w1p, b1p, w2p, b2p, *, block_b=1024):
    """y[:, :10] = relu(x @ W1 + b1) @ W2 + b2, batch-tiled over a 1-D grid."""
    B = x.shape[0]
    # bf16 x packs 16 rows per vreg sublane group -> keep the batch tile a
    # multiple of 16.
    tb = min(block_b, _round_up(B, 16))
    # On multi-TensorCore parts (v7x) make sure a big batch yields >=2 grid
    # steps so both cores get work; tiny batches stay single-step (latency).
    if B > 256 and pl.cdiv(B, tb) < 2:
        tb = _round_up(pl.cdiv(B, 2), 16)
    grid_b = pl.cdiv(B, tb)  # ragged last tile handled by Pallas masking

    # Scoped-VMEM budget: double-buffered f32 x tile + double-buffered bf16
    # output tile + resident (bf16) weights, plus headroom.  Explicit limit so
    # large tiles also land on v5e (16 MiB default scoped limit).
    needed = (2 * tb * INPUT_SIZE * 4
              + 2 * tb * LANE_PAD * 2
              + INPUT_SIZE * LANE_PAD * 2
              + LANE_PAD * LANE_PAD * 2
              + 2 * LANE_PAD * 4)
    vmem_limit = int(min(max(needed + (4 << 20), 16 << 20), 48 << 20))

    out_padded = pl.pallas_call(
        mlp_kernel,
        out_shape=jax.ShapeDtypeStruct((B, LANE_PAD), jnp.bfloat16),
        grid_spec=pltpu.PrefetchScalarGridSpec(
            num_scalar_prefetch=0,
            grid=(grid_b,),
            in_specs=[
                # x tile marches over the batch; Pallas double-buffers it.
                pl.BlockSpec((tb, INPUT_SIZE), lambda i: (i, 0)),
                # Weights / biases: constant block index -> DMA'd once, resident
                # in VMEM across all grid iterations.
                pl.BlockSpec((INPUT_SIZE, LANE_PAD), lambda i: (0, 0)),
                pl.BlockSpec((1, LANE_PAD), lambda i: (0, 0)),
                pl.BlockSpec((LANE_PAD, LANE_PAD), lambda i: (0, 0)),
                pl.BlockSpec((1, LANE_PAD), lambda i: (0, 0)),
            ],
            out_specs=pl.BlockSpec((tb, LANE_PAD), lambda i: (i, 0)),
        ),
        compiler_params=pltpu.CompilerParams(
            # Batch axis is embarrassingly parallel: shards across both TCs on v7x.
            dimension_semantics=("parallel",),
            vmem_limit_bytes=vmem_limit,
        ),
    )(x, w1p, b1p, w2p, b2p)

    return out_padded[:B, :NUM_CLASSES]


def init_params(key):
    # Mimic PyTorch nn.Linear default init: U(-1/sqrt(fan_in), 1/sqrt(fan_in))
    k1, k2, k3, k4 = jax.random.split(key, 4)
    bound1 = 1.0 / (INPUT_SIZE ** 0.5)
    bound2 = 1.0 / (HIDDEN ** 0.5)
    w1 = jax.random.uniform(k1, (INPUT_SIZE, HIDDEN), jnp.float32, -bound1, bound1)
    b1 = jax.random.uniform(k2, (HIDDEN,), jnp.float32, -bound1, bound1)
    w2 = jax.random.uniform(k3, (HIDDEN, NUM_CLASSES), jnp.float32, -bound2, bound2)
    b2 = jax.random.uniform(k4, (NUM_CLASSES,), jnp.float32, -bound2, bound2)
    return w1, b1, w2, b2


if __name__ == "__main__":
    key = jax.random.PRNGKey(0)
    kx, kp = jax.random.split(key)
    B = 64
    x = jax.random.normal(kx, (B, INPUT_SIZE), jnp.float32)
    w1, b1, w2, b2 = init_params(kp)
    w1p, b1p, w2p, b2p = prepare_params(w1, b1, w2, b2)

    # block_b=32 -> grid=(2,) so batch tiling / pipelining is exercised even at small B.
    out = mlp_forward(x, w1p, b1p, w2p, b2p, block_b=32)
    out = jax.block_until_ready(out)

    # Pure-JAX reference with the same bf16 rounding of x / weights, f32 elsewhere.
    xb = x.astype(jnp.bfloat16).astype(jnp.float32)
    w1b = w1.astype(jnp.bfloat16).astype(jnp.float32)
    w2b = w2.astype(jnp.bfloat16).astype(jnp.float32)
    ref = jnp.maximum(xb @ w1b + b1, 0.0) @ w2b + b2
    assert out.shape == (B, NUM_CLASSES)
    assert jnp.allclose(out.astype(jnp.float32), ref, atol=1e-2, rtol=1e-2)
    print("KERNEL_OK")
</pallas_src>

<mosaic_0001>
module attributes {stable_mosaic.version = 11 : i64} {
  func.func @mlp_kernel(%arg0: i32, %arg1: memref<32x784xf32, #tpu.memory_space<vmem>>, %arg2: memref<784x128xbf16, #tpu.memory_space<vmem>>, %arg3: memref<1x128xf32, #tpu.memory_space<vmem>>, %arg4: memref<128x128xbf16, #tpu.memory_space<vmem>>, %arg5: memref<1x128xf32, #tpu.memory_space<vmem>>, %arg6: memref<32x128xbf16, #tpu.memory_space<vmem>>) attributes {dimension_semantics = [#tpu.dimension_semantics<parallel>], iteration_bounds = array<i64: 2>, scalar_prefetch = 0 : i64, scratch_operands = 0 : i64, tpu.core_type = #tpu.core_type<tc>, window_params = [{transform_indices = @transform_0, window_bounds = array<i64: 32, 784>}, {pipeline_mode = #tpu.pipeline_mode<synchronous>, transform_indices = @transform_1, window_bounds = array<i64: 784, 128>}, {pipeline_mode = #tpu.pipeline_mode<synchronous>, transform_indices = @transform_2, window_bounds = array<i64: 1, 128>}, {pipeline_mode = #tpu.pipeline_mode<synchronous>, transform_indices = @transform_3, window_bounds = array<i64: 128, 128>}, {pipeline_mode = #tpu.pipeline_mode<synchronous>, transform_indices = @transform_4, window_bounds = array<i64: 1, 128>}, {transform_indices = @transform_5, window_bounds = array<i64: 32, 128>}]} {
    %c0 = arith.constant 0 : index
    %c0_0 = arith.constant 0 : index
    %0 = vector.load %arg1[%c0, %c0_0] : memref<32x784xf32, #tpu.memory_space<vmem>>, vector<32x784xf32>
    %1 = arith.truncf %0 : vector<32x784xf32> to vector<32x784xbf16>
    %c0_1 = arith.constant 0 : index
    %c0_2 = arith.constant 0 : index
    %2 = vector.load %arg2[%c0_1, %c0_2] : memref<784x128xbf16, #tpu.memory_space<vmem>>, vector<784x128xbf16>
    %cst = arith.constant dense<0.000000e+00> : vector<32x128xf32>
    %3 = tpu.matmul %1, %2, %cst {dimension_numbers = #tpu.dot_dimension_numbers<[1], [0], [0], [1], [0, 0, 1, 1], [], []>} : vector<32x784xbf16>, vector<784x128xbf16>, vector<32x128xf32> -> vector<32x128xf32>
    %c0_3 = arith.constant 0 : index
    %c0_4 = arith.constant 0 : index
    %4 = vector.load %arg3[%c0_3, %c0_4] : memref<1x128xf32, #tpu.memory_space<vmem>>, vector<1x128xf32>
    %5 = vector.broadcast %4 : vector<1x128xf32> to vector<32x128xf32>
    %6 = arith.addf %3, %5 : vector<32x128xf32>
    %cst_5 = arith.constant 0.000000e+00 : f32
    %7 = vector.broadcast %cst_5 : f32 to vector<32x128xf32>
    %8 = arith.maximumf %6, %7 : vector<32x128xf32>
    %9 = arith.truncf %8 : vector<32x128xf32> to vector<32x128xbf16>
    %c0_6 = arith.constant 0 : index
    %c0_7 = arith.constant 0 : index
    %10 = vector.load %arg4[%c0_6, %c0_7] : memref<128x128xbf16, #tpu.memory_space<vmem>>, vector<128x128xbf16>
    %cst_8 = arith.constant dense<0.000000e+00> : vector<32x128xf32>
    %11 = tpu.matmul %9, %10, %cst_8 {dimension_numbers = #tpu.dot_dimension_numbers<[1], [0], [0], [1], [0, 0, 1, 1], [], []>} : vector<32x128xbf16>, vector<128x128xbf16>, vector<32x128xf32> -> vector<32x128xf32>
    %c0_9 = arith.constant 0 : index
    %c0_10 = arith.constant 0 : index
    %12 = vector.load %arg5[%c0_9, %c0_10] : memref<1x128xf32, #tpu.memory_space<vmem>>, vector<1x128xf32>
    %13 = vector.broadcast %12 : vector<1x128xf32> to vector<32x128xf32>
    %14 = arith.addf %11, %13 : vector<32x128xf32>
    %15 = arith.truncf %14 : vector<32x128xf32> to vector<32x128xbf16>
    %c0_11 = arith.constant 0 : index
    %c0_12 = arith.constant 0 : index
    %16 = vector.load %arg6[%c0_11, %c0_12] : memref<32x128xbf16, #tpu.memory_space<vmem>>, vector<32x128xbf16>
    tpu.vector_store %arg6[%c0_11, %c0_12], %15 {strides = array<i32>} : memref<32x128xbf16, #tpu.memory_space<vmem>>, vector<32x128xbf16>,
    return
  }
  func.func @transform_0(%arg0: i32) -> (i32, i32) {
    %c0_i32 = arith.constant 0 : i32
    %c0_i32_0 = arith.constant 0 : i32
    return %arg0, %c0_i32 : i32, i32
  }
  func.func @transform_1(%arg0: i32) -> (i32, i32) {
    %c0_i32 = arith.constant 0 : i32
    %c0_i32_0 = arith.constant 0 : i32
    %c0_i32_1 = arith.constant 0 : i32
    return %c0_i32, %c0_i32_0 : i32, i32
  }
  func.func @transform_2(%arg0: i32) -> (i32, i32) {
    %c0_i32 = arith.constant 0 : i32
    %c0_i32_0 = arith.constant 0 : i32
    %c0_i32_1 = arith.constant 0 : i32
    return %c0_i32, %c0_i32_0 : i32, i32
  }
  func.func @transform_3(%arg0: i32) -> (i32, i32) {
    %c0_i32 = arith.constant 0 : i32
    %c0_i32_0 = arith.constant 0 : i32
    %c0_i32_1 = arith.constant 0 : i32
    return %c0_i32, %c0_i32_0 : i32, i32
  }
  func.func @transform_4(%arg0: i32) -> (i32, i32) {
    %c0_i32 = arith.constant 0 : i32
    %c0_i32_0 = arith.constant 0 : i32
    %c0_i32_1 = arith.constant 0 : i32
    return %c0_i32, %c0_i32_0 : i32, i32
  }
  func.func @transform_5(%arg0: i32) -> (i32, i32) {
    %c0_i32 = arith.constant 0 : i32
    %c0_i32_0 = arith.constant 0 : i32
    return %arg0, %c0_i32 : i32, i32
  }
}

</mosaic_0001>

<bundles_post_ra>
// kernel: tpu_custom_call.1
= control target key start
LH: loop header
LB: loop body
LE: loop exit
PB: predicated region body
PF: predicated region fallthrough
CT: control target
= control target key end

     0   :  { %s1841_s0 = inlined_call_operand.hbm [shape: f32[64,784], index: 0, kind: input, shape index: {}]   ;;  %s1842_s1 = inlined_call_operand.hbm [shape: bf16[784,128], index: 1, kind: input, shape index: {}]   ;;  %s1843_s2 = inlined_call_operand.vmem [shape: f32[1,128], index: 2, kind: input, shape index: {}]   ;;  %s1844_s3 = inlined_call_operand.hbm [shape: bf16[128,128], index: 3, kind: input, shape index: {}]   ;;  %s1845_s4 = inlined_call_operand.vmem [shape: f32[1,128], index: 4, kind: input, shape index: {}]   ;;  %s1846_s5 = inlined_call_operand.hbm [shape: bf16[64,128], index: 5, kind: output, shape index: {}]  }
   0x1   :  { %1847 = sst [smem:[#allocation12_spill]] %s1842_s1 }
   0x2   :  { %10 = vsyncpa [#allocation3], 0 }
   0x3   :  { %12 = vsyncpa [#allocation3 + $0x1], 0 }
   0x4   :  { %13 = vsyncpa [#allocation6], 0 }
   0x5   :  { %14 = vsyncpa [#allocation4], 0 }
   0x6   :  { %16 = vsyncpa [#allocation4 + $0x1], 0  ;;  %s1663_s18 = smov 0   ;;  %s1665_s19 = smov 0  }
   0x7   :  { %s1667_s20 = smov 0   ;;  %s1669_s21 = smov 0  }
   0x8 LB: > { %s1684_s22 = sadd.s32 4294967295, %s1623_s21   ;;  %s1069_s23 = sadd.s32 4294967294, %s1623_s21   ;;  %s1623_s21 = sphi %s1669_s21, %s1858_s21   ;;  %s1619_s20 = sphi %s1667_s20, %s1857_s20   ;;  %s1615_s19 = sphi %s1665_s19, %s1856_s19   ;;  %s1611_s18 = sphi %s1663_s18, %s1855_s18  }
   0x9   : > { %p42_p0 = scmp.ne.s32.totalorder %s1615_s19, %s1611_s18  ;;  %p43_p1 = scmp.eq.s32.totalorder %s1684_s22, 0 }
   0xa   : > { %p150_p2 = scmp.eq.s32.totalorder %s1684_s22, 1  ;;  %p156_p3 = scmp.eq.s32.totalorder %s1069_s23, 1 }
   0xb   : > { %p1693_p4 = por %p43_p1, %p42_p0  ;;  %p1070_p5 = scmp.ge.s32.totalorder %s1623_s21, 1 }
   0xc   : > { %p1698_p6 = por %p156_p3, %p42_p0  ;;  %p163_p7 = scmp.lt.s32.totalorder %s1623_s21, 3 }
   0xd   : > { %s1850_s1 = sld [smem:[#allocation12_spill]]  ;;  %s1625_s30 = smov [#allocation5]  }
   0xe   : > { %p1706_p8 = pnand %p1070_p5, %p163_p7  ;;  %s176_s6 = sshll.u32 %s1625_s30, 4  ;;  %s177_s6 = int_to_ptr.vmem [resolvable:$true] %s176_s6 }
   0xf   : > { %s191_s9 = sshll.u32 %s1844_s3, 4  ;;  %s1626_s10 = smov 64   ;;  %s192_s9 = int_to_ptr.hbm [resolvable:$true] %s191_s9 }
  0x10   : > { %p1400_p9 = pneg %p1706_p8  ;;  %s1627_s11 = smov 4  }
  0x11   : > { %s1628_s12 = smov [#allocation7]   ;;  %s1719_s14 = sadd.s32 1, %s1623_s21  }
  0x12   : > { %p1401_p10 = pnand %p1400_p9, %p43_p1  ;;  %s193_s13 = sshll.u32 %s1628_s12, 4  ;;  %s194_s13 = int_to_ptr.vmem [resolvable:$true] %s193_s13 }
  0x13   : > { %s174_s28 = sshll.u32 %s1850_s1, 4  ;;  %s29_s15 = sadd.s32 1, %s1619_s20  ;;  %s175_s28 = int_to_ptr.hbm [resolvable:$true] %s174_s28 }
  0x14   : > { %1403 = dma.hbm_to_vmem [thread:$0]  (!%p1401_p10), %s175_s28, 6272, %s177_s6, [#allocation6], %s1626_s10, %s1626_s10, %s1627_s11  }
  0x15   : > { %1406 = dma.hbm_to_vmem [thread:$0]  (!%p1401_p10), %s192_s9, 1024, %s194_s13, [#allocation6], %s1626_s10, %s1626_s10, %s1627_s11  }
  0x16   : > { %s26_s16 = ssub.s32 %s1623_s21, %s1719_s14  ;;  %p36_p12 = scmp.ne.s32.totalorder %s1619_s20, %s1615_s19 }
  0x17   : > { %p27_p13 = scmp.eq.s32.totalorder %s26_s16, 0  ;;  %p37_p0 = scmp.eq.s32.totalorder %s1623_s21, 0 }
  0x18   : > { %p1729_p3 = por %p150_p2, %p36_p12  ;;  %p1417_p5 = scmp.lt.s32.totalorder %s1623_s21, 2 }
  0x19   : > { %s1735_s23 = scalar_select %p27_p13, %s1619_s20, %s29_s15  }
  0x1a   : > { %p38_p7 = por %p37_p0, %p36_p12  ;;  %s210_s26 = sand.u32 1, %s1619_s20  }
  0x1b   : > { %s1385_s27 = smul.u32 224, %s210_s26  ;;  %s211_s12 = scalar_lea.sflag [#allocation3], %s210_s26 }
  0x1c   : > { %s1386_s28 = smul.u32 224, %s1623_s21  ;;  %p1739_p9 = pnand %p1417_p5, %p38_p7 }
  0x1d   : > { %s214_s9 = scalar_lea.vmem [#allocation2], %s1385_s27  ;;  %s1530_s6 = scalar_lea.hbm %s1841_s0, 448 }
  0x1e   : > { %s220_s8 = scalar_lea.hbm %s1841_s0, %s1386_s28  ;;  %s223_s10 = sshll.u32 %s214_s9, 4  ;;  %s224_s10 = int_to_ptr.vmem [resolvable:$true] %s223_s10 }
  0x1f   : > { %s221_s11 = sshll.u32 %s220_s8, 4  ;;  %p1527_p10 = pneg %p1739_p9  ;;  %s222_s11 = int_to_ptr.hbm [resolvable:$true] %s221_s11 }
  0x20   : > { %s1523_s13 = sshra.s32 %s222_s11, 4  ;;  %s1524_s13 = int_to_ptr.hbm [resolvable:$true] %s1523_s13 }
  0x21   : > { %s1525_s15 = scalar_lea.hbm %s1524_s13, 224  ;;  %p1531_p0 = scmp.lt.s32.totalorder %s1524_s13, %s1841_s0 }
  0x22   : > { %p1526_p2 = scmp.ne.s32.totalorder %s1524_s13, %s1525_s15  ;;  %p1532_p5 = scmp.lt.s32.totalorder %s1530_s6, %s1525_s15 }
  0x24   : > { %p1528_p12 = pnand %p1527_p10, %p1526_p2  ;;  %p1533_p7 = por %p1532_p5, %p1531_p0 }
  0x26   : > { %p1529_p13 = pneg %p1528_p12 }
  0x28   : > { %p1534_p11 = pnand %p1533_p7, %p1529_p13 }
  0x2a   : > { %1537 = shalt.err (!%p1534_p11)
}
  0x2b   : > { %s1629_s26 = smov 896   ;;  %s1630_s27 = smov 56  }
  0x2c   : > { %1410 = dma.hbm_to_vmem [thread:$0]  (!%p1739_p9), %s222_s11, 3584, %s224_s10, %s211_s12, %s1629_s26, %s1629_s26, %s1630_s27  }
  0x2d   : > { %235 = sbr.rel (%p1706_p8) target bundleno = 429 (0x1ad), region = 40  ;;  %s1759_s1 = sand.u32 (!%p1706_p8), 1, %s1615_s19  }
  0x2e   : > { %s1387_s8 = smul.u32 (!%p1706_p8), 224, %s1759_s1  ;;  %s238_s9 = scalar_lea.sflag (!%p1706_p8), [#allocation3], %s1759_s1 }
  0x30   : > { %s1763_s13 = scalar_lea.vmem (!%p1706_p8), [#allocation2], %s1387_s8 }
  0x32   : > { %1598 = dma.done.wait (%p1693_p4), %s238_s9, 3584  }
  0x33   : > { %1600 = vsyncadd (%p1693_p4), %s238_s9, 4294963712 }
  0x34   : > { %1602 = dma.done.wait (%p43_p1), [#allocation6], 7296  }
  0x35   : > { %1604 = vsyncadd (%p43_p1), [#allocation6], 4294960000  ;;  %v1323_v0 = vld [vmem:[#allocation5 + $0x38] sm:$0xff]  ;;  %v1322_v4 = vld [vmem:[#allocation5 + $0x30] sm:$0xff]  ;;  %vm720_vm0 = vcmask 130048   ;;  %s1080_s11 = sshll.u32 %s1759_s1, 4 }
  0x36   : > { %v1331_v1 = vld [vmem:[#allocation5 + $0x78] sm:$0xff]  ;;  %727 = vmatpush.bf16.msra.mxu0 %v1323_v0  ;;  %v1330_v5 = vld [vmem:[#allocation5 + $0x70] sm:$0xff]  ;;  %v1321_v8 = vld [vmem:[#allocation5 + $0x28] sm:$0xff]  ;;  %s278_s12 = scalar_lea.vmem [#allocation8], %s1080_s11  ;;  %s1373_s15 = sshll.u32 %s1684_s22, 4 }
  0x37   : > { %v1339_v2 = vld [vmem:[#allocation5 + $0xb8] sm:$0xff]  ;;  %746 = vmatpush.bf16.msra.mxu1 %v1331_v1  ;;  %v1338_v6 = vld [vmem:[#allocation5 + $0xb0] sm:$0xff]  ;;  %v1329_v9 = vld [vmem:[#allocation5 + $0x68] sm:$0xff]  ;;  %s973_s7 = scalar_lea.hbm %s1846_s5, %s1373_s15  ;;  %s974_s28 = sshll.u32 %s278_s12, 4  ;;  %s975_s28 = int_to_ptr.vmem [resolvable:$true] %s974_s28 }
  0x38   : > { %v1347_v3 = vld [vmem:[#allocation5 + $0xf8] sm:$0xff]  ;;  %765 = vmatpush.bf16.msra.mxu2 %v1339_v2  ;;  %v1346_v7 = vld [vmem:[#allocation5 + $0xf0] sm:$0xff]  ;;  %v1337_v10 = vld [vmem:[#allocation5 + $0xa8] sm:$0xff]  ;;  %s976_s26 = sshll.u32 %s973_s7, 4  ;;  %s962_s27 = scalar_lea.sflag [#allocation4], %s1759_s1  ;;  %s977_s26 = int_to_ptr.hbm [resolvable:$true] %s976_s26 }
  0x39   : > { %784 = vmatpush.bf16.msra.mxu3 %v1347_v3  ;;  %v1345_v11 = vld [vmem:[#allocation5 + $0xe8] sm:$0xff]  ;;  %v1320_v12 = vld [vmem:[#allocation5 + $0x20] sm:$0xff]  ;;  %v1319_v16 = vld [vmem:[#allocation5 + $0x18] sm:$0xff]  ;;  %s1567_s8 = sshra.s32 %s977_s26, 4  ;;  %s1573_s24 = scalar_lea.hbm %s1846_s5, 32  ;;  %s1568_s8 = int_to_ptr.hbm [resolvable:$true] %s1567_s8 }
  0x3a   : > { %728 = vmatpush.bf16.msra.mxu0 %v1322_v4  ;;  %v1328_v13 = vld [vmem:[#allocation5 + $0x60] sm:$0xff]  ;;  %v1327_v17 = vld [vmem:[#allocation5 + $0x58] sm:$0xff]  ;;  %v1318_v20 = vld [vmem:[#allocation5 + $0x10] sm:$0xff]  ;;  %s1569_s9 = scalar_lea.hbm %s1568_s8, 16  ;;  %p1574_p11 = scmp.lt.s32.totalorder %s1568_s8, %s1846_s5 }
  0x3b   : > { %747 = vmatpush.bf16.msra.mxu1 %v1330_v5  ;;  %v1336_v14 = vld [vmem:[#allocation5 + $0xa0] sm:$0xff]  ;;  %v1335_v18 = vld [vmem:[#allocation5 + $0x98] sm:$0xff]  ;;  %v1326_v21 = vld [vmem:[#allocation5 + $0x50] sm:$0xff]  ;;  %p1570_p1 = scmp.ne.s32.totalorder %s1568_s8, %s1569_s9  ;;  %p1575_p9 = scmp.lt.s32.totalorder %s1573_s24, %s1569_s9 }
  0x3c   : > { %766 = vmatpush.bf16.msra.mxu2 %v1338_v6  ;;  %v1344_v15 = vld [vmem:[#allocation5 + $0xe0] sm:$0xff]  ;;  %v1343_v19 = vld [vmem:[#allocation5 + $0xd8] sm:$0xff]  ;;  %v1334_v22 = vld [vmem:[#allocation5 + $0x90] sm:$0xff] }
  0x3d   : > { %785 = vmatpush.bf16.msra.mxu3 %v1346_v7  ;;  %v1342_v23 = vld [vmem:[#allocation5 + $0xd0] sm:$0xff]  ;;  %v1317_v24 = vld [vmem:[#allocation5 + $0x8] sm:$0xff]  ;;  %v1316_v28 = vld [vmem:[#allocation5] sm:$0xff]  ;;  %p1571_p4 = pnand %p1570_p1, %p1729_p3  ;;  %p1576_p2 = por %p1575_p9, %p1574_p11 }
  0x3e   : > { %729 = vmatpush.bf16.msra.mxu0 %v1321_v8  ;;  %v1325_v25 = vld [vmem:[#allocation5 + $0x48] sm:$0xff]  ;;  %v1324_v29 = vld [vmem:[#allocation5 + $0x40] sm:$0xff]  ;;  %v289_v33 = vld [vmem:[%s1763_s13 + $0x38] sm:$0xff] }
  0x3f   : > { %748 = vmatpush.bf16.msra.mxu1 %v1329_v9  ;;  %v1333_v26 = vld [vmem:[#allocation5 + $0x88] sm:$0xff]  ;;  %v1332_v30 = vld [vmem:[#allocation5 + $0x80] sm:$0xff]  ;;  %v284_v36 = vld [vmem:[%s1763_s13 + $0x10] sm:$0xff]  ;;  %p1572_p8 = pneg %p1571_p4 }
  0x40   : > { %767 = vmatpush.bf16.msra.mxu2 %v1337_v10  ;;  %v1341_v27 = vld [vmem:[#allocation5 + $0xc8] sm:$0xff]  ;;  %v1340_v31 = vld [vmem:[#allocation5 + $0xc0] sm:$0xff]  ;;  %v1355_v39 = vld [vmem:[#allocation5 + $0x138] sm:$0xff] }
  0x41   : > { %786 = vmatpush.bf16.msra.mxu3 %v1345_v11  ;;  %v282_v32 = vld [vmem:[%s1763_s13] sm:$0xff]  ;;  %v283_v34 = vld [vmem:[%s1763_s13 + $0x8] sm:$0xff]  ;;  %v285_v40 = vld [vmem:[%s1763_s13 + $0x18] sm:$0xff]  ;;  %p1577_p10 = pnand %p1576_p2, %p1572_p8 }
  0x42   : > { %730 = vmatpush.bf16.msra.mxu0 %v1320_v12  ;;  %v290_v35 = vld [vmem:[%s1763_s13 + $0x40] sm:$0xff]  ;;  %v291_v37 = vld [vmem:[%s1763_s13 + $0x48] sm:$0xff]  ;;  %v292_v41 = vld [vmem:[%s1763_s13 + $0x50] sm:$0xff]  ;;  %v310_v42 = vpack.c.bf16 %v289_v33, %v282_v32 }
  0x43   : > { %749 = vmatpush.bf16.msra.mxu1 %v1328_v13  ;;  %v1364_v38 = vld [vmem:[#allocation5 + $0x180] sm:$0xff]  ;;  %v311_v43 = vpack.c.bf16 %v290_v35, %v283_v34  ;;  %v312_v44 = vpack.c.bf16 %v291_v37, %v284_v36  ;;  %v1363_v45 = vld [vmem:[#allocation5 + $0x178] sm:$0xff]  ;;  %v313_v46 = vpack.c.bf16 %v292_v41, %v285_v40  ;;  %v1354_v47 = vld [vmem:[#allocation5 + $0x130] sm:$0xff] }
  0x44   : > { %768 = vmatpush.bf16.msra.mxu2 %v1336_v14  ;;  %v1362_v48 = vld [vmem:[#allocation5 + $0x170] sm:$0xff]  ;;  %v1353_v49 = vld [vmem:[#allocation5 + $0x128] sm:$0xff]  ;;  %v1352_v51 = vld [vmem:[#allocation5 + $0x120] sm:$0xff] }
  0x45   : > { %787 = vmatpush.bf16.msra.mxu3 %v1344_v15  ;;  %v1361_v50 = vld [vmem:[#allocation5 + $0x168] sm:$0xff]  ;;  %v1360_v52 = vld [vmem:[#allocation5 + $0x160] sm:$0xff]  ;;  %v296_v53 = vld [vmem:[%s1763_s13 + $0x70] sm:$0xff] }
  0x46   : > { %731 = vmatpush.bf16.msra.mxu0 %v1319_v16  ;;  %v303_v54 = vld [vmem:[%s1763_s13 + $0xa8] sm:$0xff]  ;;  %v297_v55 = vld [vmem:[%s1763_s13 + $0x78] sm:$0xff]  ;;  %v304_v56 = vld [vmem:[%s1763_s13 + $0xb0] sm:$0xff] }
  0x47   : > { %750 = vmatpush.bf16.msra.mxu1 %v1327_v17  ;;  %v298_v57 = vld [vmem:[%s1763_s13 + $0x80] sm:$0xff]  ;;  %v305_v58 = vld [vmem:[%s1763_s13 + $0xb8] sm:$0xff]  ;;  %v299_v60 = vld [vmem:[%s1763_s13 + $0x88] sm:$0xff]  ;;  %v317_v62 = vpack.c.bf16 %v303_v54, %v296_v53  ;;  %v318_v63 = vpack.c.bf16 %v304_v56, %v297_v55 }
  0x48   : > { %769 = vmatpush.bf16.msra.mxu2 %v1335_v18  ;;  %v1351_v59 = vld [vmem:[#allocation5 + $0x118] sm:$0xff]  ;;  %v306_v61 = vld [vmem:[%s1763_s13 + $0xc0] sm:$0xff]  ;;  %v319_v0 = vpack.c.bf16 %v305_v58, %v298_v57  ;;  %v1350_v3 = vld [vmem:[#allocation5 + $0x110] sm:$0xff] }
  0x49   : > { %788 = vmatpush.bf16.msra.mxu3 %v1343_v19  ;;  %v1359_v1 = vld [vmem:[#allocation5 + $0x158] sm:$0xff]  ;;  %v320_v2 = vpack.c.bf16 %v306_v61, %v299_v60  ;;  %v1358_v4 = vld [vmem:[#allocation5 + $0x150] sm:$0xff]  ;;  %v1349_v5 = vld [vmem:[#allocation5 + $0x108] sm:$0xff] }
  0x4a   : > { %732 = vmatpush.bf16.msra.mxu0 %v1318_v20  ;;  %v1357_v6 = vld [vmem:[#allocation5 + $0x148] sm:$0xff]  ;;  %v1348_v7 = vld [vmem:[#allocation5 + $0x100] sm:$0xff]  ;;  %v293_v10 = vld [vmem:[%s1763_s13 + $0x58] sm:$0xff] }
  0x4b   : > { %751 = vmatpush.bf16.msra.mxu1 %v1326_v21  ;;  %v1356_v8 = vld [vmem:[#allocation5 + $0x140] sm:$0xff]  ;;  %v287_v11 = vld [vmem:[%s1763_s13 + $0x28] sm:$0xff]  ;;  %v288_v13 = vld [vmem:[%s1763_s13 + $0x30] sm:$0xff] }
  0x4c   : > { %770 = vmatpush.bf16.msra.mxu2 %v1334_v22  ;;  %v286_v9 = vld [vmem:[%s1763_s13 + $0x20] sm:$0xff]  ;;  %v295_v14 = vld [vmem:[%s1763_s13 + $0x68] sm:$0xff]  ;;  %v300_v18 = vld [vmem:[%s1763_s13 + $0x90] sm:$0xff] }
  0x4d   : > { %789 = vmatpush.bf16.msra.mxu3 %v1342_v23  ;;  %v294_v12 = vld [vmem:[%s1763_s13 + $0x60] sm:$0xff]  ;;  %v314_v15 = vpack.c.bf16 %v293_v10, %v286_v9  ;;  %v316_v17 = vpack.c.bf16 %v295_v14, %v288_v13  ;;  %v307_v19 = vld [vmem:[%s1763_s13 + $0xc8] sm:$0xff]  ;;  %v301_v20 = vld [vmem:[%s1763_s13 + $0x98] sm:$0xff] }
  0x4e   : > { %733 = vmatpush.bf16.msra.mxu0 %v1317_v24  ;;  %v315_v16 = vpack.c.bf16 %v294_v12, %v287_v11  ;;  %v308_v21 = vld [vmem:[%s1763_s13 + $0xd0] sm:$0xff]  ;;  %v302_v22 = vld [vmem:[%s1763_s13 + $0xa0] sm:$0xff]  ;;  %v309_v23 = vld [vmem:[%s1763_s13 + $0xd8] sm:$0xff]  ;;  %v321_v24 = vpack.c.bf16 %v307_v19, %v300_v18 }
  0x4f   : > { %752 = vmatpush.bf16.msra.mxu1 %v1325_v25  ;;  %v322_v25 = vpack.c.bf16 %v308_v21, %v301_v20  ;;  %v1369_v32 = vld [vmem:[#allocation7 + $0x20] sm:$0xff]  ;;  %v1368_v33 = vld [vmem:[#allocation7 + $0x18] sm:$0xff]  ;;  %v1367_v37 = vld [vmem:[#allocation7 + $0x10] sm:$0xff] }
  0x50   : > { %771 = vmatpush.bf16.msra.mxu2 %v1333_v26  ;;  %v323_v26 = vpack.c.bf16 %v309_v23, %v302_v22 }
  0x51   : > { %790 = vmatpush.bf16.msra.mxu3 %v1341_v27  ;;  %v1372_v27 = vld [vmem:[#allocation7 + $0x38] sm:$0xff] }
  0x52   : > { %734 = vmatpush.bf16.msra.mxu0 %v1316_v28  ;;  %v1371_v28 = vld [vmem:[#allocation7 + $0x30] sm:$0xff] }
  0x53   : > { %753 = vmatpush.bf16.msra.mxu1 %v1324_v29  ;;  %v1370_v29 = vld [vmem:[#allocation7 + $0x28] sm:$0xff] }
  0x54   : > { %772 = vmatpush.bf16.msra.mxu2 %v1332_v30 }
  0x55   : > { %791 = vmatpush.bf16.msra.mxu3 %v1340_v31  ;;  %735 = vmatmul.bf16.vlgmr.msra.gmra.mxu0 %v310_v42  ;;  %v1365_v42 = vld [vmem:[#allocation7] sm:$0xff] }
  0x56   : > { %803 = vmatpush.bf16.msrb.mxu0 %v1355_v39  ;;  %754 = vmatmul.bf16.vlgmr.msra.gmra.mxu1 %v311_v43  ;;  %v1461_v43 = vld [vmem:[%s1843_s2] ss:$0 sm:$0xff] }
  0x57   : > { %773 = vmatmul.bf16.vlgmr.msra.gmra.mxu2 %v312_v44  ;;  %822 = vmatpush.bf16.msrb.mxu1 %v1363_v45 }
  0x58   : > { %848 = vmatpush.bf16.msrb.mxu2 %v1364_v38  ;;  %792 = vmatmul.bf16.vlgmr.msra.gmra.mxu3 %v313_v46  ;;  %v1366_v38 = vld [vmem:[#allocation7 + $0x8] sm:$0xff] }
  0x59   : > { %934 = vmatpush.bf16.msrb.mxu3 %v1372_v27 }
  0x5a   : > { %804 = vmatpush.bf16.msrb.mxu0 %v1354_v47 }
  0x5b   : > { %823 = vmatpush.bf16.msrb.mxu1 %v1362_v48 }
  0x5d   : > { %935 = vmatpush.bf16.msrb.mxu3 %v1371_v28 }
  0x5e   : > { %805 = vmatpush.bf16.msrb.mxu0 %v1353_v49 }
  0x5f   : > { %824 = vmatpush.bf16.msrb.mxu1 %v1361_v50 }
  0x61   : > { %936 = vmatpush.bf16.msrb.mxu3 %v1370_v29 }
  0x62   : > { %806 = vmatpush.bf16.msrb.mxu0 %v1352_v51 }
  0x63   : > { %825 = vmatpush.bf16.msrb.mxu1 %v1360_v52 }
  0x65   : > { %740 = vmatmul.bf16.gmra.mxu0 %v317_v62  ;;  %937 = vmatpush.bf16.msrb.mxu3 %v1369_v32 }
  0x66   : > { %807 = vmatpush.bf16.msrb.mxu0 %v1351_v59  ;;  %759 = vmatmul.bf16.gmra.mxu1 %v318_v63 }
  0x67   : > { %778 = vmatmul.bf16.gmra.mxu2 %v319_v0  ;;  %826 = vmatpush.bf16.msrb.mxu1 %v1359_v1 }
  0x68   : > { %797 = vmatmul.bf16.gmra.mxu3 %v320_v2 }
  0x69   : > { %938 = vmatpush.bf16.msrb.mxu3 %v1368_v33 }
  0x6a   : > { %808 = vmatpush.bf16.msrb.mxu0 %v1350_v3 }
  0x6b   : > { %827 = vmatpush.bf16.msrb.mxu1 %v1358_v4 }
  0x6d   : > { %939 = vmatpush.bf16.msrb.mxu3 %v1367_v37 }
  0x6e   : > { %809 = vmatpush.bf16.msrb.mxu0 %v1349_v5 }
  0x6f   : > { %828 = vmatpush.bf16.msrb.mxu1 %v1357_v6 }
  0x71   : > { %940 = vmatpush.bf16.msrb.mxu3 %v1366_v38 }
  0x72   : > { %810 = vmatpush.bf16.msrb.mxu0 %v1348_v7 }
  0x73   : > { %829 = vmatpush.bf16.msrb.mxu1 %v1356_v8 }
  0x75   : > { %811 = vmatmul.bf16.vlgmr.msrb.gmra.mxu0 %v314_v15  ;;  %941 = vmatpush.bf16.msrb.mxu3 %v1365_v42 }
  0x76   : > { %830 = vmatmul.bf16.vlgmr.msrb.gmra.mxu1 %v315_v16 }
  0x77   : > { %1277 = vmatmul.msk.bf16.vlgmr.msrb.gmra.mxu2 %vm720_vm0, %v316_v17 }
  0x85   : > { %816 = vmatmul.bf16.gmra.mxu0 %v321_v24 }
  0x86   : > { %835 = vmatmul.bf16.gmra.mxu1 %v322_v25 }
  0x87   : > { %1278 = vmatmul.msk.bf16.gmra.mxu2 %vm720_vm0, %v323_v26 }
  0xd2   : > { %v736_v30 = vpop.f32.mrf.mxu0 }
  0xd3   : > { %v755_v31 = vpop.f32.mrf.mxu1  ;;  %v737_v48 = vadd.f32 %v1461_v43, %v736_v30 }
  0xd5   : > { %v756_v49 = vadd.f32 %v755_v31, %v737_v48 }
  0xda   : > { %v774_v34 = vpop.f32.mrf.mxu2  ;;  %v738_v35 = vpop.f32.mrf.mxu0 }
  0xdb   : > { %v757_v36 = vpop.f32.mrf.mxu1  ;;  %v793_v44 = vpop.f32.mrf.mxu3  ;;  %v739_v50 = vadd.f32 %v1461_v43, %v738_v35  ;;  %v775_v55 = vadd.f32 %v774_v34, %v756_v49  ;;  %v1462_v35 = vld [vmem:[%s1845_s4] ss:$0 sm:$0xff] }
  0xdd   : > { %v758_v56 = vadd.f32 %v757_v36, %v739_v50  ;;  %v794_v58 = vadd.f32 %v793_v44, %v775_v55 }
  0xe2   : > { %v776_v39 = vpop.f32.mrf.mxu2  ;;  %v741_v40 = vpop.f32.mrf.mxu0 }
  0xe3   : > { %v760_v41 = vpop.f32.mrf.mxu1  ;;  %v795_v54 = vpop.f32.mrf.mxu3  ;;  %v777_v57 = vadd.f32 %v776_v39, %v758_v56  ;;  %v742_v0 = vadd.f32 %v1461_v43, %v741_v40 }
  0xe5   : > { %v796_v60 = vadd.f32 %v795_v54, %v777_v57  ;;  %v761_v4 = vadd.f32 %v760_v41, %v742_v0 }
  0xea   : > { %v779_v45 = vpop.f32.mrf.mxu2  ;;  %v743_v46 = vpop.f32.mrf.mxu0 }
  0xeb   : > { %v762_v47 = vpop.f32.mrf.mxu1  ;;  %v798_v2 = vpop.f32.mrf.mxu3  ;;  %v744_v5 = vadd.f32 %v1461_v43, %v743_v46  ;;  %v780_v11 = vadd.f32 %v779_v45, %v761_v4 }
  0xed   : > { %v763_v12 = vadd.f32 %v762_v47, %v744_v5  ;;  %v799_v19 = vadd.f32 %v798_v2, %v780_v11 }
  0xf2   : > { %v781_v51 = vpop.f32.mrf.mxu2  ;;  %v812_v52 = vpop.f32.mrf.mxu0 }
  0xf3   : > { %v831_v53 = vpop.f32.mrf.mxu1  ;;  %v813_v61 = vadd.f32 %v812_v52, %v794_v58  ;;  %v782_v16 = vadd.f32 %v781_v51, %v763_v12  ;;  %v800_v18 = vpop.f32.mrf.mxu3 }
  0xf5   : > { %v832_v3 = vadd.f32 %v831_v53, %v813_v61  ;;  %v801_v21 = vadd.f32 %v800_v18, %v782_v16 }
  0xfa   : > { %v850_v59 = vpop.f32.mrf.mxu2  ;;  %v814_v62 = vpop.f32.mrf.mxu0 }
  0xfb   : > { %v833_v63 = vpop.f32.mrf.mxu1  ;;  %v815_v1 = vadd.f32 %v814_v62, %v796_v60  ;;  %v851_v6 = vadd.f32 %v850_v59, %v832_v3 }
  0xfd   : > { %v834_v7 = vadd.f32 %v833_v63, %v815_v1  ;;  %v860_v13 = vmax.f32 %v851_v6, 0.0 }
 0x102   : > { %v852_v8 = vpop.f32.mrf.mxu2  ;;  %v817_v10 = vpop.f32.mrf.mxu0 }
 0x103   : > { %v853_v9 = vadd.f32 %v852_v8, %v834_v7  ;;  %v836_v15 = vpop.f32.mrf.mxu1  ;;  %v818_v22 = vadd.f32 %v817_v10, %v799_v19 }
 0x105   : > { %v861_v14 = vmax.f32 %v853_v9, 0.0  ;;  %v837_v25 = vadd.f32 %v836_v15, %v818_v22 }
 0x107   : > { %v864_v17 = vpack.c.bf16 %v861_v14, %v860_v13 }
 0x109   : > { %942 = vmatmul.bf16.vlgmr.msrb.gmra.mxu3 %v864_v17 }
 0x10a   : > { %v855_v20 = vpop.f32.mrf.mxu2  ;;  %v819_v23 = vpop.f32.mrf.mxu0 }
 0x10b   : > { %v820_v24 = vadd.f32 %v819_v23, %v801_v21  ;;  %v838_v26 = vpop.f32.mrf.mxu1  ;;  %v856_v27 = vadd.f32 %v855_v20, %v837_v25 }
 0x10d   : > { %v839_v28 = vadd.f32 %v838_v26, %v820_v24  ;;  %v862_v31 = vmax.f32 %v856_v27, 0.0 }
 0x112   : > { %v857_v29 = vpop.f32.mrf.mxu2 }
 0x113   : > { %v858_v30 = vadd.f32 %v857_v29, %v839_v28 }
 0x115   : > { %v863_v32 = vmax.f32 %v858_v30, 0.0 }
 0x117   : > { %v865_v33 = vpack.c.bf16 %v863_v32, %v862_v31 }
 0x119   : > { %947 = vmatmul.bf16.gmra.mxu3 %v865_v33 }
 0x18c   : > { %v943_v34 = vpop.f32.mrf.mxu3 }
 0x18d   : > { %v944_v37 = vadd.f32 %v1462_v35, %v943_v34 }
 0x194   : > { %v945_v36 = vpop.f32.mrf.mxu3 }
 0x195   : > { %v946_v38 = vadd.f32 %v1462_v35, %v945_v36 }
 0x197   : > { %v1377_v39 = vpack.c.bf16 %v946_v38, %v944_v37 }
 0x199   : > { %1378 = vst [vmem:[%s278_s12] sm:$0xff] %v1377_v39  }
 0x19c   : > { %v948_v40 = vpop.f32.mrf.mxu3 }
 0x19d   : > { %v949_v42 = vadd.f32 %v1462_v35, %v948_v40 }
 0x1a4   : > { %v950_v41 = vpop.f32.mrf.mxu3 }
 0x1a5   : > { %v951_v43 = vadd.f32 %v1462_v35, %v950_v41 }
 0x1a7   : > { %v1382_v44 = vpack.c.bf16 %v951_v43, %v949_v42 }
 0x1a9   : > { %1384 = vst [vmem:[%s278_s12 + $0x8] sm:$0xff] %v1382_v44  }
 0x1aa   : > { %1580 = shalt.err (!%p1577_p10)
}
 0x1ab   : > { %s1631_s1 = smov 64   ;;  %s1632_s10 = smov 4  }
 0x1ac   : > { %1398 = dma.vmem_to_hbm [thread:$0]  (%p1729_p3), %s975_s28, 256, %s977_s26, %s962_s27, %s1631_s1, %s1631_s1, %s1632_s10  }
 0x1ad PF: > { %s991_s11 = sand.u32 1, %s1611_s18   ;;  %p1854_p12 = scmp.ge.s32.totalorder %s1623_s21, 2 }
 0x1ae   : > { %s992_s12 = scalar_lea.sflag [#allocation4], %s991_s11 }
 0x1af   : > { %p1412_p13 = pnand %p1854_p12, %p1698_p6 }
 0x1b1   : > { %p1413_p0 = pneg %p1412_p13 }
 0x1b3   : > { %1606 = dma.done.wait (%p1413_p0), %s992_s12, 256  }
 0x1b4   : > { %1608 = vsyncadd (%p1413_p0), %s992_s12, 4294967040  ;;  %p19_p5 = scmp.ge.s32.totalorder %s1719_s14, 4   ;;  %s1855_s18 = smov %s1615_s19 }
 0x1b5   : > { %s1856_s19 = smov %s1619_s20  ;;  %s1857_s20 = smov %s1735_s23 }
 0x1b6   : > { %s1858_s21 = smov %s1719_s14  ;;  %21 = sbr.rel (!%p19_p5) target bundleno = 8 (0x8), region = 93 }
 0x1bb   :  { %998 = vsyncpa [#allocation3], 1 }
 0x1bc   :  { %1000 = vsyncpa [#allocation3 + $0x1], 1 }
 0x1bd   :  { %1001 = vsyncpa [#allocation6], 1 }
 0x1be   :  { %1002 = vsyncpa [#allocation4], 1 }
 0x1bf   :  { %1004 = vsyncpa [#allocation4 + $0x1], 1 }

</bundles_post_ra>
